<compile_context>
chip_gen: v6e
topology: v6e:2x2x1
jax: 0.10.0
libtpu: 0.0.40
codegen_flags: <defaults>
</compile_context>

<pallas_src>
import functools
import math

import jax
import jax.numpy as jnp
from jax.experimental import pallas as pl
from jax.experimental.pallas import tpu as pltpu


def _round_up(x: int, m: int) -> int:
    return ((x + m - 1) // m) * m


def _sin_pos_emb_kernel(x_ref, out_ref, *, half_dim: int, neg_scale: float):
    # x_ref:   (TILE_B, 1)        f32 timesteps (batch on sublanes)
    # out_ref: (TILE_B, 2*half_dim)
    #
    # Frequency table rebuilt in-register (no runtime freqs input / DMA).
    idx = jax.lax.broadcasted_iota(jnp.int32, (1, half_dim), 1)
    freqs = jnp.exp(idx.astype(jnp.float32) * neg_scale)          # (1, half_dim)

    args = x_ref[...] * freqs                                      # (TILE_B, half_dim)
    s = jnp.sin(args)
    c = jnp.cos(args)

    if half_dim % 128 == 0:
        # Both halves are 128-lane aligned and dense: two unmasked stores,
        # no cross-lane shuffle needed.
        out_ref[:, :half_dim] = s.astype(out_ref.dtype)
        out_ref[:, half_dim:] = c.astype(out_ref.dtype)
    else:
        # half_dim < 128 (or unaligned): a store at lane offset half_dim would
        # be a masked vst.msk; lane-concat on the (idle) XLU and issue one
        # dense full-row store instead -- halves store-slot traffic, which is
        # the binding slot on v5e's single vst.
        out_ref[...] = jnp.concatenate([s, c], axis=-1).astype(out_ref.dtype)


def sinusoidal_pos_emb(
    x: jax.Array,
    dim: int,
    *,
    tile_b: int | None = None,
    out_dtype=jnp.float32,
    vmem_budget_bytes: int = 16 * 1024 * 1024,
) -> jax.Array:
    """x: (B,) array of (diffusion) timesteps -> (B, dim) embedding."""
    assert dim % 2 == 0 and dim >= 4, "dim must be even and >= 4"
    half_dim = dim // 2
    B = x.shape[0]
    neg_scale = -(math.log(10000.0) / (half_dim - 1))

    x2d = x.astype(jnp.float32).reshape(B, 1)      # glue reshape in plain JAX

    # Bytes-based row cap (double-buffered): out block = dim*itemsize per row,
    # in block = 1 lane padded to 128 f32 lanes per row.  16 MiB default budget
    # stays well inside v7x's 32 MiB scoped / 64 MiB physical VMEM.
    out_itemsize = jnp.dtype(out_dtype).itemsize
    bytes_per_row = 2 * (dim * out_itemsize + 128 * 4)
    max_rows = max(8, (vmem_budget_bytes // bytes_per_row) // 8 * 8)

    if tile_b is None:
        # Default: one resident block (single grid step) whenever it fits.
        tile_b = min(_round_up(B, 8), max_rows)
    tile_b = max(8, _round_up(min(tile_b, max_rows), 8))
    grid = (pl.cdiv(B, tile_b),)

    kernel = functools.partial(
        _sin_pos_emb_kernel, half_dim=half_dim, neg_scale=neg_scale
    )

    out = pl.pallas_call(
        kernel,
        out_shape=jax.ShapeDtypeStruct((B, dim), out_dtype),
        grid_spec=pl.GridSpec(
            grid=grid,
            in_specs=[
                # (tile_b, 1): last dim equals the full array dim, sublane dim
                # is a multiple of 8 -> no (8,128) issue.
                pl.BlockSpec((tile_b, 1), lambda i: (i, 0)),
            ],
            out_specs=pl.BlockSpec((tile_b, dim), lambda i: (i, 0)),
        ),
        compiler_params=pltpu.CompilerParams(
            dimension_semantics=("parallel",),
        ),
    )(x2d)
    return out


def _reference(x: jax.Array, dim: int) -> jax.Array:
    half_dim = dim // 2
    emb = math.log(10000.0) / (half_dim - 1)
    emb = jnp.exp(jnp.arange(half_dim, dtype=jnp.float32) * -emb)
    emb = x.astype(jnp.float32)[:, None] * emb[None, :]
    return jnp.concatenate([jnp.sin(emb), jnp.cos(emb)], axis=-1)


if __name__ == "__main__":
    key = jax.random.PRNGKey(0)
    k0, k1, k2 = jax.random.split(key, 3)

    # Tolerance note: timesteps go up to ~1000, so ulp-level differences
    # between the in-kernel EUP exp/sin/cos and XLA's transcendental
    # implementations are amplified to ~1e-4 absolute in sin/cos of (x*freq).
    # Any semantic bug (wrong scale, swapped halves, wrong freq index) shows up
    # at O(1), so these tolerances still catch real errors.
    ATOL, RTOL = 5e-4, 1e-4

    # Shipped shape: B=8 timesteps, dim=32 -> single grid step, lane-concat store.
    B, DIM = 8, 32
    x = jax.random.uniform(k0, (B,), dtype=jnp.float32) * 1000.0
    out = jax.block_until_ready(sinusoidal_pos_emb(x, DIM))
    ref = _reference(x, DIM)
    assert out.shape == (B, DIM)
    assert jnp.allclose(out, ref, atol=ATOL, rtol=RTOL), "mismatch vs reference"

    # Multi-step grid + partial tail block (B not a multiple of tile_b).
    B2 = 20
    x2 = jax.random.uniform(k1, (B2,), dtype=jnp.float32) * 1000.0
    out2 = jax.block_until_ready(sinusoidal_pos_emb(x2, DIM, tile_b=8))
    ref2 = _reference(x2, DIM)
    assert out2.shape == (B2, DIM)
    assert jnp.allclose(out2, ref2, atol=ATOL, rtol=RTOL), "mismatch vs reference (tiled)"

    # Lane-aligned path: half_dim % 128 == 0 -> two unmasked split stores.
    B3, DIM3 = 16, 256
    x3 = jax.random.uniform(k2, (B3,), dtype=jnp.float32) * 1000.0
    out3 = jax.block_until_ready(sinusoidal_pos_emb(x3, DIM3))
    ref3 = _reference(x3, DIM3)
    assert out3.shape == (B3, DIM3)
    assert jnp.allclose(out3, ref3, atol=ATOL, rtol=RTOL), "mismatch vs reference (aligned)"

    print("KERNEL_OK")
</pallas_src>

<mosaic_0001>
module attributes {stable_mosaic.version = 11 : i64} {
  func.func @_sin_pos_emb_kernel(%arg0: i32, %arg1: memref<8x1xf32, #tpu.memory_space<vmem>>, %arg2: memref<8x32xf32, #tpu.memory_space<vmem>>) attributes {dimension_semantics = [#tpu.dimension_semantics<parallel>], iteration_bounds = array<i64: 1>, scalar_prefetch = 0 : i64, scratch_operands = 0 : i64, tpu.core_type = #tpu.core_type<tc>, window_params = [{transform_indices = @transform_0, window_bounds = array<i64: 8, 1>}, {transform_indices = @transform_1, window_bounds = array<i64: 8, 32>}]} {
    %0 = tpu.iota {dimensions = array<i32: 1>} : vector<1x16xi32>
    %1 = arith.sitofp %0 : vector<1x16xi32> to vector<1x16xf32>
    %cst = arith.constant -0.614022672 : f32
    %2 = vector.broadcast %cst : f32 to vector<1x16xf32>
    %3 = arith.mulf %1, %2 : vector<1x16xf32>
    %4 = math.exp %3 : vector<1x16xf32>
    %c0 = arith.constant 0 : index
    %c0_0 = arith.constant 0 : index
    %5 = vector.load %arg1[%c0, %c0_0] : memref<8x1xf32, #tpu.memory_space<vmem>>, vector<8x1xf32>
    %6 = vector.broadcast %5 : vector<8x1xf32> to vector<8x16xf32>
    %7 = vector.broadcast %4 : vector<1x16xf32> to vector<8x16xf32>
    %8 = arith.mulf %6, %7 : vector<8x16xf32>
    %9 = math.sin %8 : vector<8x16xf32>
    %10 = math.cos %8 : vector<8x16xf32>
    %11 = tpu.concatenate %9, %10 in 1 : vector<8x16xf32>, vector<8x16xf32> -> vector<8x32xf32>
    %c0_1 = arith.constant 0 : index
    %c0_2 = arith.constant 0 : index
    %12 = vector.load %arg2[%c0_1, %c0_2] : memref<8x32xf32, #tpu.memory_space<vmem>>, vector<8x32xf32>
    tpu.vector_store %arg2[%c0_1, %c0_2], %11 {strides = array<i32>} : memref<8x32xf32, #tpu.memory_space<vmem>>, vector<8x32xf32>,
    return
  }
  func.func @transform_0(%arg0: i32) -> (i32, i32) {
    %c0_i32 = arith.constant 0 : i32
    %c0_i32_0 = arith.constant 0 : i32
    return %arg0, %c0_i32 : i32, i32
  }
  func.func @transform_1(%arg0: i32) -> (i32, i32) {
    %c0_i32 = arith.constant 0 : i32
    %c0_i32_0 = arith.constant 0 : i32
    return %arg0, %c0_i32 : i32, i32
  }
}

</mosaic_0001>

<bundles_post_ra>
// kernel: tpu_custom_call.1
= control target key start
LH: loop header
LB: loop body
LE: loop exit
PB: predicated region body
PF: predicated region fallthrough
CT: control target
= control target key end

     0   :  { %v301_v1 = vmov 0   ;;  %s347_s0 = inlined_call_operand.vmem [shape: f32[8,1], index: 0, kind: input, shape index: {}]   ;;  %s348_s1 = inlined_call_operand.hbm [shape: f32[8,32], index: 1, kind: output, shape index: {}]  }
   0x1   :  { %v15_v0 = vld [vmem:[%s347_s0] sm:$0xff]  ;;  %272 = vset.pattern.permute.xlu0 %v301_v1 }
   0x2   :  { %18 = vperm.xlu0 %272, %v15_v0  }
   0x3   :  { %6 = vsyncpa [#allocation3], 0  ;;  %v9_v2 = vlaneseq  ;;  %v302_v20 = vmov 683565275   ;;  %v303_v22 = vmov 2475754826  }
   0x4   :  { %v304_v25 = vmov 2131351028   ;;  %v305_v28 = vmov 2102212464   ;;  %v306_v31 = vmov 920167782  }
   0x5   :  { %v10_v3 = vand.u32 127, %v9_v2  ;;  %v307_v34 = vmov 1326507024   ;;  %s308_s0 = smov 16   ;;  %s309_s8 = smov [#allocation2]  }
   0x6   :  { %s243_s9 = sshll.u32 %s309_s8, 4  ;;  %s244_s9 = int_to_ptr.vmem [resolvable:$true] %s243_s9 }
   0x7   :  { %v11_v4 = vcvt.s32.f32 %v10_v3  ;;  %s279_s10 = scalar_lea.vmem %s244_s9, 128  ;;  %p284_p1 = scmp.lt.s32.totalorder %s244_s9, %s244_s9 }
   0x8   :  { %p280_p0 = scmp.ne.s32.totalorder %s244_s9, %s279_s10  ;;  %p285_p2 = scmp.lt.s32.totalorder %s279_s10, %s279_s10 }
   0x9   :  { %v12_v5 = vmul.f32 -0.6140227, %v11_v4 }
   0xa   :  { %p286_p3 = por %p285_p2, %p284_p1 }
   0xb   :  { %v13_v6 = vmul.f32 1.442695, %v12_v5 }
   0xc   :  { %p287_p4 = pnand %p286_p3, %p280_p0 }
   0xd   :  { %273 = vpow2.f32 %v13_v6 }
  0x1a   :  { %v274_v7 = vpop.eup %273 }
  0x7d   :  { %v19_v8 = vpop.permute.xlu0 %18 }
  0x7e   :  { %v323_v9 = vmul.f32 %v274_v7, %v19_v8 }
  0x80   :  { %v25_v10 = vand.u32 2139095040, %v323_v9  ;;  %v22_v14 = vand.u32 2147483647, %v323_v9  ;;  %vm24_vm7 = vcmp.lt.s32.totalorder %v323_v9, 0  ;;  %vm114_vm15 = vweird.f32 %v323_v9 }
  0x82   :  { %v26_v11 = vshrl.u32 %v25_v10, 23  ;;  %v29_v17 = vand.u32 8388607, %v22_v14  ;;  %vm23_vm8 = vcmp.le.f32.partialorder %v22_v14, 0.7853982 }
  0x84   :  { %v251_v12 = vadd.s32 4294967169, %v26_v11  ;;  %v30_v36 = vor.u32 8388608, %v29_v17 }
  0x86   :  { %v32_v13 = vadd.s32 1, %v251_v12  ;;  %v70_v50 = vshll.u32 %v30_v36, 8 }
  0x88   :  { %vm33_vm0 = vcmp.gt.s32.totalorder %v32_v13, 0 }
  0x89   :  { %v34_v15 = vsel %vm33_vm0, %v32_v13, 0  ;;  %vm233_vm0 = vcmask 130048  }
  0x8a   :  { %v36_v16 = vand.u32 31, %v34_v15  ;;  %v35_v19 = vshrl.u32 %v34_v15, 5 }
  0x8c   :  { %v37_v18 = vsub.s32 32, %v36_v16  ;;  %v39_v21 = vshll.u32 %v302_v20, %v36_v16  ;;  %v42_v23 = vshll.u32 %v303_v22, %v36_v16  ;;  %v45_v27 = vshll.u32 %v304_v25, %v36_v16 }
  0x8d   :  { %v48_v30 = vshll.u32 %v305_v28, %v36_v16  ;;  %v51_v33 = vshll.u32 %v306_v31, %v36_v16  ;;  %vm54_vm1 = vcmp.lt.s32.totalorder %v35_v19, 1  ;;  %vm57_vm2 = vcmp.lt.s32.totalorder %v35_v19, 4 }
  0x8e   :  { %v40_v24 = vshrl.u32 %v303_v22, %v37_v18  ;;  %v43_v26 = vshrl.u32 %v304_v25, %v37_v18  ;;  %v46_v29 = vshrl.u32 %v305_v28, %v37_v18  ;;  %v49_v32 = vshrl.u32 %v306_v31, %v37_v18 }
  0x8f   :  { %v52_v35 = vshrl.u32 %v307_v34, %v37_v18  ;;  %v38_v45 = vshrl.u32 %v302_v20, %v37_v18  ;;  %vm56_vm3 = vcmp.lt.s32.totalorder %v35_v19, 3  ;;  %vm55_vm4 = vcmp.lt.s32.totalorder %v35_v19, 2 }
  0x90   :  { %v41_v37 = vor.u32 %v40_v24, %v39_v21  ;;  %v44_v38 = vor.u32 %v43_v26, %v42_v23  ;;  %v47_v39 = vor.u32 %v46_v29, %v45_v27  ;;  %v50_v40 = vor.u32 %v49_v32, %v48_v30 }
  0x91   :  { %v53_v41 = vor.u32 %v52_v35, %v51_v33 }
  0x92   :  { %v59_v42 = vsel %vm57_vm2, %v47_v39, 2102212464  ;;  %v62_v43 = vsel %vm54_vm1, %v41_v37, %v44_v38  ;;  %v66_v44 = vsel %vm54_vm1, %v44_v38, %v47_v39  ;;  %v63_v46 = vsel %vm57_vm2, %v50_v40, 920167782 }
  0x93   :  { %v67_v47 = vsel %vm57_vm2, %v53_v41, 1326507024  ;;  %v64_v48 = vsel %vm56_vm3, %v47_v39, %v63_v46  ;;  %v58_v51 = vsel %vm54_vm1, %v38_v45, %v41_v37  ;;  %v60_v52 = vsel %vm56_vm3, %v44_v38, %v59_v42 }
  0x94   :  { %v68_v49 = vsel %vm56_vm3, %v50_v40, %v67_v47  ;;  %v65_v53 = vsel %vm55_vm4, %v62_v43, %v64_v48  ;;  %v61_v59 = vsel %vm55_vm4, %v58_v51, %v60_v52  ;;  %vm235_vm1 = vcmask 261120  }
  0x95   :  { %v69_v54 = vsel %vm55_vm4, %v66_v44, %v68_v49  ;;  %v332_v57 = vmul.u32.u64.low %v70_v50, %v65_v53  ;;  %v333_v58 = vmul.u32.u64.high %v70_v50, %v65_v53, %v332_v57  ;;  %v77_v61 = vmul.u32 %v70_v50, %v61_v59 }
  0x96   :  { %v329_v55 = vmul.u32.u64.low %v70_v50, %v69_v54  ;;  %v330_v56 = vmul.u32.u64.high %v70_v50, %v69_v54, %v329_v55 }
  0x97   :  { %v80_v60 = vadd.s32 1, %v333_v58 }
  0x98   :  { %vm79_vm5 = vc.u32 %v330_v56, %v332_v57  ;;  %v78_v10 = vadd.s32 %v332_v57, %v330_v56 }
  0x99   :  { %v81_v62 = vsel %vm79_vm5, %v80_v60, %v333_v58 }
  0x9a   :  { %v82_v63 = vadd.s32 %v81_v62, %v77_v61 }
  0x9c   :  { %v83_v0 = vadd.s32 536870912, %v82_v63 }
  0x9e   :  { %v84_v1 = vshrl.u32 %v83_v0, 30 }
  0xa0   :  { %v85_v2 = vshll.u32 %v84_v1, 30  ;;  %v108_v24 = vsub.s32 4, %v84_v1 }
  0xa2   :  { %v86_v3 = vsub.s32 %v82_v63, %v85_v2  ;;  %v109_v27 = vsel %vm24_vm7, %v108_v24, %v84_v1 }
  0xa3   :  { %v111_v28 = vsel %vm23_vm8, 0, %v109_v27 }
  0xa4   :  { %v88_v4 = vsub.s32 0, %v86_v3  ;;  %v115_v29 = vadd.s32 3, %v111_v28  ;;  %v219_v31 = vand.u32 3, %v111_v28 }
  0xa6   :  { %v252_v5 = vmin.u32 %v88_v4, %v86_v3  ;;  %v116_v30 = vand.u32 3, %v115_v29  ;;  %vm224_vm10 = vcmp.eq.s32.totalorder %v219_v31, 2  ;;  %vm221_vm12 = vcmp.eq.s32.totalorder %v219_v31, 0 }
  0xa7   :  { %vm220_vm14 = vcmp.lt.s32.totalorder %v219_v31, 2 }
  0xa8   :  { %v90_v6 = vclz %v252_v5  ;;  %vm121_vm9 = vcmp.eq.s32.totalorder %v116_v30, 2  ;;  %vm118_vm11 = vcmp.eq.s32.totalorder %v116_v30, 0  ;;  %vm117_vm13 = vcmp.lt.s32.totalorder %v116_v30, 2 }
  0xaa   :  { %v253_v7 = vadd.s32 4294967294, %v90_v6 }
  0xac   :  { %vm254_vm6 = vcmp.lt.s32.totalorder %v253_v7, 0 }
  0xad   :  { %v93_v8 = vsel %vm254_vm6, 0, %v253_v7 }
  0xae   :  { %v94_v11 = vsub.s32 32, %v93_v8  ;;  %v98_v12 = vsub.s32 4294967266, %v93_v8  ;;  %v95_v13 = vshll.u32 %v86_v3, %v93_v8 }
  0xb0   :  { %v96_v15 = vshrl.u32 %v78_v10, %v94_v11  ;;  %v99_v16 = vadd.s32 127, %v98_v12 }
  0xb2   :  { %v97_v17 = vor.u32 %v96_v15, %v95_v13  ;;  %v100_v18 = vshll.u32 %v99_v16, 23 }
  0xb4   :  { %v101_v19 = vor.u32 4788187, %v100_v18  ;;  %v104_v21 = vcvt.s32.f32 %v97_v17 }
  0xb6   :  { %v102_v20 = vand.u32 2147483647, %v101_v19 }
  0xb8   :  { %v105_v22 = vmul.f32 %v104_v21, %v102_v20 }
  0xba   :  { %v106_v23 = vxor.u32 2147483648, %v105_v22 }
  0xbc   :  { %v107_v25 = vsel %vm24_vm7, %v106_v23, %v105_v22 }
  0xbd   :  { %v110_v26 = vsel %vm23_vm8, %v323_v9, %v107_v25 }
  0xbe   :  { %275 = vcosq.f32 %v110_v26 }
  0xbf   :  { %277 = vsinq.f32 %v110_v26 }
  0xcb   :  { %v276_v32 = vpop.eup %275 }
  0xcc   :  { %v278_v33 = vpop.eup %277  ;;  %v122_v34 = vxor.u32 2147483648, %v276_v32 }
  0xcd   :  { %v119_v35 = vxor.u32 2147483648, %v278_v33 }
  0xce   :  { %v226_v36 = vsel %vm224_vm10, %v122_v34, %v278_v33  ;;  %v123_v37 = vsel %vm121_vm9, %v122_v34, %v278_v33 }
  0xcf   :  { %v223_v14 = vsel %vm221_vm12, %v276_v32, %v119_v35  ;;  %v120_v38 = vsel %vm118_vm11, %v276_v32, %v119_v35 }
  0xd0   :  { %v227_v39 = vsel %vm220_vm14, %v223_v14, %v226_v36  ;;  %v124_v40 = vsel %vm117_vm13, %v120_v38, %v123_v37 }
  0xd1   :  { %v228_v41 = vsel %vm114_vm15, nan, %v227_v39  ;;  %v125_v42 = vsel %vm114_vm15, nan, %v124_v40 }
  0xd2   :  { %230 = vrot.lane.b32.xlu0 %v228_v41, %s308_s0 }
 0x144   :  { %v231_v43 = vpop.permute.xlu0 %230 }
 0x145   :  { %v234_v44 = vsel %vm233_vm0, %v125_v42, %v231_v43 }
 0x146   :  { %236 = vst.msk [vmem:[#allocation2] sm:$0xff] %vm235_vm1, %v234_v44 }
 0x147   :  { %290 = shalt.err (!%p287_p4)
}
 0x148   :  { %246 = dma.vmem_to_hbm [thread:$0]  %s244_s9, 128, %s348_s1, [#allocation3]  }
 0x149   :  { %299 = dma.done.wait [#allocation3], 128  }
 0x14a   :  { %300 = vsyncadd [#allocation3], 4294967168 }
 0x14b   :  { %250 = vsyncpa [#allocation3], 1 }

</bundles_post_ra>
